<compile_context>
chip_gen: v5e
topology: v5e:2x2
jax: 0.10.0
libtpu: 0.0.40
codegen_flags: <defaults>
</compile_context>

<pallas_src>
import functools
import math

import jax
import jax.numpy as jnp
from jax import lax
from jax.experimental import pallas as pl
from jax.experimental.pallas import tpu as pltpu

LANES = 128
MAX_BLOCK_ROWS = 4096  # (4096, 128) f32 block = 2 MiB; x2 inputs x2 buffers = 8 MiB VMEM


def _round_up(x, m):
    return ((x + m - 1) // m) * m


def _sublane_multiple(dtype):
    # Packed sublane tile: 8 for 32-bit, 16 for bf16/f16, 32 for 8-bit types.
    return max(8, 32 // jnp.dtype(dtype).itemsize)


def _dice_bce_kernel(x_ref, t_ref, out_ref,
                     acc_inter, acc_p, acc_t, acc_bce,
                     *, valid_rows, block_rows, total, pad, need_mask,
                     smooth, dice_w, bce_w):
    i = pl.program_id(0)

    @pl.when(i == 0)
    def _():
        acc_inter[...] = jnp.zeros_like(acc_inter)
        acc_p[...] = jnp.zeros_like(acc_p)
        acc_t[...] = jnp.zeros_like(acc_t)
        acc_bce[...] = jnp.zeros_like(acc_bce)

    x = x_ref[...].astype(jnp.float32)   # (block_rows, LANES) logits
    t = t_ref[...].astype(jnp.float32)   # (block_rows, LANES) targets

    # Shared transcendental: e = exp(-|x|), reused by both sigmoid and BCE tail.
    e = jnp.exp(-jnp.abs(x))
    inv = 1.0 / (1.0 + e)
    p = jnp.where(x >= 0.0, inv, e * inv)               # sigmoid(x), stable
    # Numerically-stable BCE-with-logits (matches torch.nn.BCEWithLogitsLoss):
    #   max(x, 0) - x*t + log(1 + exp(-|x|))
    bce = jnp.maximum(x, 0.0) - x * t + jnp.log1p(e)

    pt = p * t
    if need_mask:
        # grid = cdiv(rows, block_rows): the final block can extend past the
        # array and those rows hold unspecified data.  Select (not multiply)
        # so NaN/Inf garbage cannot leak into the sums.
        row = lax.broadcasted_iota(jnp.int32, (block_rows, LANES), 0)
        valid = (i * block_rows + row) < valid_rows
        zero = jnp.float32(0.0)
        pt = jnp.where(valid, pt, zero)
        p = jnp.where(valid, p, zero)
        t = jnp.where(valid, t, zero)
        bce = jnp.where(valid, bce, zero)

    # Lane-dense partial sums: reduce only along sublanes each step; the single
    # cross-lane reduction to a scalar happens once in the finalize branch.
    acc_inter[...] += jnp.sum(pt, axis=0, keepdims=True)
    acc_p[...] += jnp.sum(p, axis=0, keepdims=True)
    acc_t[...] += jnp.sum(t, axis=0, keepdims=True)
    acc_bce[...] += jnp.sum(bce, axis=0, keepdims=True)

    @pl.when(i == pl.num_programs(0) - 1)
    def _():
        # Analytic correction for the small zero-padded tail (x=0, t=0):
        #   sigmoid(0) = 0.5  -> sum(p) over-counts by 0.5 per pad element
        #   bce(0, 0)  = ln 2 -> BCE sum over-counts by ln(2) per pad element
        inter = jnp.sum(acc_inter[...], keepdims=True)            # (1, 1)
        p_sum = jnp.sum(acc_p[...], keepdims=True) - 0.5 * pad
        t_sum = jnp.sum(acc_t[...], keepdims=True)
        bce_sum = jnp.sum(acc_bce[...], keepdims=True) - math.log(2.0) * pad

        dice_coeff = (2.0 * inter + smooth) / (p_sum + t_sum + smooth)
        d_loss = 1.0 - dice_coeff
        bce_loss = bce_sum / jnp.float32(total)
        out_ref[...] = dice_w * d_loss + bce_w * bce_loss


@functools.partial(
    jax.jit,
    static_argnames=("dice_weight", "bce_weight", "smooth", "max_block_rows"))
def dice_bce_loss(logits, targets, dice_weight=0.5, bce_weight=0.5,
                  smooth=1e-6, max_block_rows=MAX_BLOCK_ROWS):
    total = logits.size
    sub = max(_sublane_multiple(logits.dtype), _sublane_multiple(targets.dtype))
    rows = pl.cdiv(total, LANES)
    padded_rows = _round_up(rows, sub)
    pad = padded_rows * LANES - total          # tiny: < sub*LANES elements

    x = logits.reshape(-1)
    t = targets.reshape(-1)
    if pad:
        # Only fires when total is not a multiple of sub*128 (e.g. 1024 for
        # f32); the zero-padded tail is corrected analytically in the kernel.
        x = jnp.pad(x, (0, pad))
        t = jnp.pad(t, (0, pad))
    x = x.reshape(padded_rows, LANES)
    t = t.reshape(padded_rows, LANES)

    block_rows = min(int(max_block_rows), padded_rows)
    block_rows = _round_up(block_rows, sub)
    grid = (pl.cdiv(padded_rows, block_rows),)
    need_mask = (padded_rows % block_rows) != 0

    kernel = functools.partial(
        _dice_bce_kernel,
        valid_rows=padded_rows,
        block_rows=block_rows,
        total=total,
        pad=pad,
        need_mask=need_mask,
        smooth=float(smooth),
        dice_w=float(dice_weight),
        bce_w=float(bce_weight),
    )

    # Double-buffered input blocks + small headroom for internal scratch.
    in_block_bytes = 2 * block_rows * LANES * (x.dtype.itemsize + t.dtype.itemsize)
    vmem_limit = max(in_block_bytes + (4 << 20), 16 << 20)

    out = pl.pallas_call(
        kernel,
        out_shape=jax.ShapeDtypeStruct((1, 1), jnp.float32),
        grid_spec=pltpu.PrefetchScalarGridSpec(
            num_scalar_prefetch=0,
            grid=grid,
            in_specs=[
                pl.BlockSpec((block_rows, LANES), lambda i: (i, 0)),
                pl.BlockSpec((block_rows, LANES), lambda i: (i, 0)),
            ],
            out_specs=pl.BlockSpec((1, 1), lambda i: (0, 0)),
            scratch_shapes=[pltpu.VMEM((1, LANES), jnp.float32)] * 4,
        ),
        compiler_params=pltpu.CompilerParams(
            dimension_semantics=("arbitrary",),   # grid axis is a reduction
            vmem_limit_bytes=int(vmem_limit),
        ),
        cost_estimate=pl.CostEstimate(
            flops=16 * total,
            transcendentals=2 * total,
            bytes_accessed=logits.nbytes + targets.nbytes + 4,
        ),
    )(x, t)
    return out[0, 0]


def _reference(logits, targets, dice_weight=0.5, bce_weight=0.5, smooth=1e-6):
    x = logits.astype(jnp.float32).reshape(-1)
    t = targets.astype(jnp.float32).reshape(-1)
    p = jax.nn.sigmoid(x)
    inter = jnp.sum(p * t)
    dice = (2.0 * inter + smooth) / (jnp.sum(p) + jnp.sum(t) + smooth)
    d_loss = 1.0 - dice
    bce = jnp.mean(jnp.maximum(x, 0.0) - x * t + jnp.log1p(jnp.exp(-jnp.abs(x))))
    return dice_weight * d_loss + bce_weight * bce


if __name__ == "__main__":
    key = jax.random.PRNGKey(0)
    k1, k2, k3, k4 = jax.random.split(key, 4)

    # NCHW logits and binary targets, small segmentation-like shapes.
    logits = jax.random.normal(k1, (2, 4, 16, 16), dtype=jnp.float32)
    targets = (jax.random.uniform(k2, (2, 4, 16, 16)) > 0.5).astype(jnp.float32)

    loss = jax.block_until_ready(dice_bce_loss(logits, targets))
    ref = _reference(logits, targets)
    assert jnp.allclose(loss, ref, rtol=1e-5, atol=1e-5), (loss, ref)

    # Ragged shape (element count not lane-aligned) + small block override to
    # exercise the partial-block row mask and the zero-pad correction paths.
    logits2 = jax.random.normal(k3, (2, 3, 15, 17), dtype=jnp.float32)
    targets2 = (jax.random.uniform(k4, (2, 3, 15, 17)) > 0.5).astype(jnp.float32)
    loss2 = jax.block_until_ready(
        dice_bce_loss(logits2, targets2, max_block_rows=8))
    ref2 = _reference(logits2, targets2)
    assert jnp.allclose(loss2, ref2, rtol=1e-5, atol=1e-5), (loss2, ref2)

    print("KERNEL_OK")
</pallas_src>

<mosaic_0001>
module attributes {stable_mosaic.version = 11 : i64} {
  func.func @_dice_bce_kernel(%arg0: i32, %arg1: memref<16x128xf32, #tpu.memory_space<vmem>>, %arg2: memref<16x128xf32, #tpu.memory_space<vmem>>, %arg3: memref<1x1xf32, #tpu.memory_space<vmem>>, %arg4: memref<1x128xf32, #tpu.memory_space<vmem>>, %arg5: memref<1x128xf32, #tpu.memory_space<vmem>>, %arg6: memref<1x128xf32, #tpu.memory_space<vmem>>, %arg7: memref<1x128xf32, #tpu.memory_space<vmem>>) attributes {dimension_semantics = [#tpu.dimension_semantics<arbitrary>], iteration_bounds = array<i64: 1>, scalar_prefetch = 0 : i64, scratch_operands = 4 : i64, tpu.core_type = #tpu.core_type<tc>, window_params = [{transform_indices = @transform_0, window_bounds = array<i64: 16, 128>}, {transform_indices = @transform_1, window_bounds = array<i64: 16, 128>}, {pipeline_mode = #tpu.pipeline_mode<synchronous>, transform_indices = @transform_2, window_bounds = array<i64: 1, 1>}]} {
    %c0_i32 = arith.constant 0 : i32
    %0 = arith.cmpi eq, %arg0, %c0_i32 : i32
    %1 = arith.extui %0 : i1 to i32
    %c0_i32_0 = arith.constant 0 : i32
    %2 = arith.cmpi ne, %1, %c0_i32_0 : i32
    scf.if %2 {
      %cst_30 = arith.constant 0.000000e+00 : f32
      %47 = vector.broadcast %cst_30 : f32 to vector<1x128xf32>
      %c0_31 = arith.constant 0 : index
      %c0_32 = arith.constant 0 : index
      %48 = vector.load %arg4[%c0_31, %c0_32] : memref<1x128xf32, #tpu.memory_space<vmem>>, vector<1x128xf32>
      tpu.vector_store %arg4[%c0_31, %c0_32], %47 {strides = array<i32>} : memref<1x128xf32, #tpu.memory_space<vmem>>, vector<1x128xf32>,
      %cst_33 = arith.constant 0.000000e+00 : f32
      %49 = vector.broadcast %cst_33 : f32 to vector<1x128xf32>
      %c0_34 = arith.constant 0 : index
      %c0_35 = arith.constant 0 : index
      %50 = vector.load %arg5[%c0_34, %c0_35] : memref<1x128xf32, #tpu.memory_space<vmem>>, vector<1x128xf32>
      tpu.vector_store %arg5[%c0_34, %c0_35], %49 {strides = array<i32>} : memref<1x128xf32, #tpu.memory_space<vmem>>, vector<1x128xf32>,
      %cst_36 = arith.constant 0.000000e+00 : f32
      %51 = vector.broadcast %cst_36 : f32 to vector<1x128xf32>
      %c0_37 = arith.constant 0 : index
      %c0_38 = arith.constant 0 : index
      %52 = vector.load %arg6[%c0_37, %c0_38] : memref<1x128xf32, #tpu.memory_space<vmem>>, vector<1x128xf32>
      tpu.vector_store %arg6[%c0_37, %c0_38], %51 {strides = array<i32>} : memref<1x128xf32, #tpu.memory_space<vmem>>, vector<1x128xf32>,
      %cst_39 = arith.constant 0.000000e+00 : f32
      %53 = vector.broadcast %cst_39 : f32 to vector<1x128xf32>
      %c0_40 = arith.constant 0 : index
      %c0_41 = arith.constant 0 : index
      %54 = vector.load %arg7[%c0_40, %c0_41] : memref<1x128xf32, #tpu.memory_space<vmem>>, vector<1x128xf32>
      tpu.vector_store %arg7[%c0_40, %c0_41], %53 {strides = array<i32>} : memref<1x128xf32, #tpu.memory_space<vmem>>, vector<1x128xf32>,
    } else {
    }
    %c0 = arith.constant 0 : index
    %c0_1 = arith.constant 0 : index
    %3 = vector.load %arg1[%c0, %c0_1] : memref<16x128xf32, #tpu.memory_space<vmem>>, vector<16x128xf32>
    %c0_2 = arith.constant 0 : index
    %c0_3 = arith.constant 0 : index
    %4 = vector.load %arg2[%c0_2, %c0_3] : memref<16x128xf32, #tpu.memory_space<vmem>>, vector<16x128xf32>
    %5 = math.absf %3 : vector<16x128xf32>
    %cst = arith.constant 0.000000e+00 : f32
    %6 = vector.broadcast %cst : f32 to vector<16x128xf32>
    %7 = arith.subf %6, %5 : vector<16x128xf32>
    %8 = math.exp %7 : vector<16x128xf32>
    %cst_4 = arith.constant 1.000000e+00 : f32
    %9 = vector.broadcast %cst_4 : f32 to vector<16x128xf32>
    %10 = arith.addf %9, %8 : vector<16x128xf32>
    %cst_5 = arith.constant 1.000000e+00 : f32
    %11 = vector.broadcast %cst_5 : f32 to vector<16x128xf32>
    %12 = arith.divf %11, %10 : vector<16x128xf32>
    %cst_6 = arith.constant 0.000000e+00 : f32
    %13 = vector.broadcast %cst_6 : f32 to vector<16x128xf32>
    %14 = arith.cmpf oge, %3, %13 : vector<16x128xf32>
    %15 = arith.mulf %8, %12 : vector<16x128xf32>
    %16 = arith.select %14, %12, %15 : vector<16x128xi1>, vector<16x128xf32>
    %cst_7 = arith.constant 0.000000e+00 : f32
    %17 = vector.broadcast %cst_7 : f32 to vector<16x128xf32>
    %18 = arith.maximumf %3, %17 : vector<16x128xf32>
    %19 = arith.mulf %3, %4 : vector<16x128xf32>
    %20 = arith.subf %18, %19 : vector<16x128xf32>
    %21 = math.log1p %8 : vector<16x128xf32>
    %22 = arith.addf %20, %21 : vector<16x128xf32>
    %23 = arith.mulf %16, %4 : vector<16x128xf32>
    %c0_8 = arith.constant 0 : index
    %c0_9 = arith.constant 0 : index
    %24 = vector.load %arg4[%c0_8, %c0_9] : memref<1x128xf32, #tpu.memory_space<vmem>>, vector<1x128xf32>
    %cst_10 = arith.constant dense<0.000000e+00> : vector<128xf32>
    %25 = vector.multi_reduction <add>, %23, %cst_10 [0] : vector<16x128xf32> to vector<128xf32>
    %26 = vector.shape_cast %25 : vector<128xf32> to vector<1x128xf32>
    %27 = arith.addf %24, %26 : vector<1x128xf32>
    %c0_11 = arith.constant 0 : index
    %c0_12 = arith.constant 0 : index
    %28 = vector.load %arg4[%c0_11, %c0_12] : memref<1x128xf32, #tpu.memory_space<vmem>>, vector<1x128xf32>
    tpu.vector_store %arg4[%c0_11, %c0_12], %27 {strides = array<i32>} : memref<1x128xf32, #tpu.memory_space<vmem>>, vector<1x128xf32>,
    %c0_13 = arith.constant 0 : index
    %c0_14 = arith.constant 0 : index
    %29 = vector.load %arg5[%c0_13, %c0_14] : memref<1x128xf32, #tpu.memory_space<vmem>>, vector<1x128xf32>
    %cst_15 = arith.constant dense<0.000000e+00> : vector<128xf32>
    %30 = vector.multi_reduction <add>, %16, %cst_15 [0] : vector<16x128xf32> to vector<128xf32>
    %31 = vector.shape_cast %30 : vector<128xf32> to vector<1x128xf32>
    %32 = arith.addf %29, %31 : vector<1x128xf32>
    %c0_16 = arith.constant 0 : index
    %c0_17 = arith.constant 0 : index
    %33 = vector.load %arg5[%c0_16, %c0_17] : memref<1x128xf32, #tpu.memory_space<vmem>>, vector<1x128xf32>
    tpu.vector_store %arg5[%c0_16, %c0_17], %32 {strides = array<i32>} : memref<1x128xf32, #tpu.memory_space<vmem>>, vector<1x128xf32>,
    %c0_18 = arith.constant 0 : index
    %c0_19 = arith.constant 0 : index
    %34 = vector.load %arg6[%c0_18, %c0_19] : memref<1x128xf32, #tpu.memory_space<vmem>>, vector<1x128xf32>
    %cst_20 = arith.constant dense<0.000000e+00> : vector<128xf32>
    %35 = vector.multi_reduction <add>, %4, %cst_20 [0] : vector<16x128xf32> to vector<128xf32>
    %36 = vector.shape_cast %35 : vector<128xf32> to vector<1x128xf32>
    %37 = arith.addf %34, %36 : vector<1x128xf32>
    %c0_21 = arith.constant 0 : index
    %c0_22 = arith.constant 0 : index
    %38 = vector.load %arg6[%c0_21, %c0_22] : memref<1x128xf32, #tpu.memory_space<vmem>>, vector<1x128xf32>
    tpu.vector_store %arg6[%c0_21, %c0_22], %37 {strides = array<i32>} : memref<1x128xf32, #tpu.memory_space<vmem>>, vector<1x128xf32>,
    %c0_23 = arith.constant 0 : index
    %c0_24 = arith.constant 0 : index
    %39 = vector.load %arg7[%c0_23, %c0_24] : memref<1x128xf32, #tpu.memory_space<vmem>>, vector<1x128xf32>
    %cst_25 = arith.constant dense<0.000000e+00> : vector<128xf32>
    %40 = vector.multi_reduction <add>, %22, %cst_25 [0] : vector<16x128xf32> to vector<128xf32>
    %41 = vector.shape_cast %40 : vector<128xf32> to vector<1x128xf32>
    %42 = arith.addf %39, %41 : vector<1x128xf32>
    %c0_26 = arith.constant 0 : index
    %c0_27 = arith.constant 0 : index
    %43 = vector.load %arg7[%c0_26, %c0_27] : memref<1x128xf32, #tpu.memory_space<vmem>>, vector<1x128xf32>
    tpu.vector_store %arg7[%c0_26, %c0_27], %42 {strides = array<i32>} : memref<1x128xf32, #tpu.memory_space<vmem>>, vector<1x128xf32>,
    %c0_i32_28 = arith.constant 0 : i32
    %44 = arith.cmpi eq, %arg0, %c0_i32_28 : i32
    %45 = arith.extui %44 : i1 to i32
    %c0_i32_29 = arith.constant 0 : i32
    %46 = arith.cmpi ne, %45, %c0_i32_29 : i32
    scf.if %46 {
      %c0_30 = arith.constant 0 : index
      %c0_31 = arith.constant 0 : index
      %47 = vector.load %arg4[%c0_30, %c0_31] : memref<1x128xf32, #tpu.memory_space<vmem>>, vector<1x128xf32>
      %48 = vector.shape_cast %47 : vector<1x128xf32> to vector<1x1x128xf32>
      %cst_32 = arith.constant dense<0.000000e+00> : vector<1xf32>
      %49 = vector.multi_reduction <add>, %48, %cst_32 [1, 2] : vector<1x1x128xf32> to vector<1xf32>
      %50 = vector.shape_cast %49 : vector<1xf32> to vector<1x1x1xf32>
      %51 = vector.extract %50[0, 0, 0] : f32 from vector<1x1x1xf32>
      %52 = vector.broadcast %51 : f32 to vector<1x1xf32>
      %c0_33 = arith.constant 0 : index
      %c0_34 = arith.constant 0 : index
      %53 = vector.load %arg5[%c0_33, %c0_34] : memref<1x128xf32, #tpu.memory_space<vmem>>, vector<1x128xf32>
      %54 = vector.shape_cast %53 : vector<1x128xf32> to vector<1x1x128xf32>
      %cst_35 = arith.constant dense<0.000000e+00> : vector<1xf32>
      %55 = vector.multi_reduction <add>, %54, %cst_35 [1, 2] : vector<1x1x128xf32> to vector<1xf32>
      %56 = vector.shape_cast %55 : vector<1xf32> to vector<1x1x1xf32>
      %57 = vector.extract %56[0, 0, 0] : f32 from vector<1x1x1xf32>
      %58 = vector.broadcast %57 : f32 to vector<1x1xf32>
      %cst_36 = arith.constant 0.000000e+00 : f32
      %59 = vector.broadcast %cst_36 : f32 to vector<1x1xf32>
      %60 = arith.subf %58, %59 : vector<1x1xf32>
      %c0_37 = arith.constant 0 : index
      %c0_38 = arith.constant 0 : index
      %61 = vector.load %arg6[%c0_37, %c0_38] : memref<1x128xf32, #tpu.memory_space<vmem>>, vector<1x128xf32>
      %62 = vector.shape_cast %61 : vector<1x128xf32> to vector<1x1x128xf32>
      %cst_39 = arith.constant dense<0.000000e+00> : vector<1xf32>
      %63 = vector.multi_reduction <add>, %62, %cst_39 [1, 2] : vector<1x1x128xf32> to vector<1xf32>
      %64 = vector.shape_cast %63 : vector<1xf32> to vector<1x1x1xf32>
      %65 = vector.extract %64[0, 0, 0] : f32 from vector<1x1x1xf32>
      %66 = vector.broadcast %65 : f32 to vector<1x1xf32>
      %c0_40 = arith.constant 0 : index
      %c0_41 = arith.constant 0 : index
      %67 = vector.load %arg7[%c0_40, %c0_41] : memref<1x128xf32, #tpu.memory_space<vmem>>, vector<1x128xf32>
      %68 = vector.shape_cast %67 : vector<1x128xf32> to vector<1x1x128xf32>
      %cst_42 = arith.constant dense<0.000000e+00> : vector<1xf32>
      %69 = vector.multi_reduction <add>, %68, %cst_42 [1, 2] : vector<1x1x128xf32> to vector<1xf32>
      %70 = vector.shape_cast %69 : vector<1xf32> to vector<1x1x1xf32>
      %71 = vector.extract %70[0, 0, 0] : f32 from vector<1x1x1xf32>
      %72 = vector.broadcast %71 : f32 to vector<1x1xf32>
      %cst_43 = arith.constant 0.000000e+00 : f32
      %73 = vector.broadcast %cst_43 : f32 to vector<1x1xf32>
      %74 = arith.subf %72, %73 : vector<1x1xf32>
      %cst_44 = arith.constant 2.000000e+00 : f32
      %75 = vector.broadcast %cst_44 : f32 to vector<1x1xf32>
      %76 = arith.mulf %75, %52 : vector<1x1xf32>
      %cst_45 = arith.constant 9.99999997E-7 : f32
      %77 = vector.broadcast %cst_45 : f32 to vector<1x1xf32>
      %78 = arith.addf %76, %77 : vector<1x1xf32>
      %79 = arith.addf %60, %66 : vector<1x1xf32>
      %cst_46 = arith.constant 9.99999997E-7 : f32
      %80 = vector.broadcast %cst_46 : f32 to vector<1x1xf32>
      %81 = arith.addf %79, %80 : vector<1x1xf32>
      %82 = arith.divf %78, %81 : vector<1x1xf32>
      %cst_47 = arith.constant 1.000000e+00 : f32
      %83 = vector.broadcast %cst_47 : f32 to vector<1x1xf32>
      %84 = arith.subf %83, %82 : vector<1x1xf32>
      %cst_48 = arith.constant 2.048000e+03 : f32
      %85 = vector.broadcast %cst_48 : f32 to vector<1x1xf32>
      %86 = arith.divf %74, %85 : vector<1x1xf32>
      %cst_49 = arith.constant 5.000000e-01 : f32
      %87 = vector.broadcast %cst_49 : f32 to vector<1x1xf32>
      %88 = arith.mulf %87, %84 : vector<1x1xf32>
      %cst_50 = arith.constant 5.000000e-01 : f32
      %89 = vector.broadcast %cst_50 : f32 to vector<1x1xf32>
      %90 = arith.mulf %89, %86 : vector<1x1xf32>
      %91 = arith.addf %88, %90 : vector<1x1xf32>
      %c0_51 = arith.constant 0 : index
      %c0_52 = arith.constant 0 : index
      %92 = vector.load %arg3[%c0_51, %c0_52] : memref<1x1xf32, #tpu.memory_space<vmem>>, vector<1x1xf32>
      tpu.vector_store %arg3[%c0_51, %c0_52], %91 {strides = array<i32>} : memref<1x1xf32, #tpu.memory_space<vmem>>, vector<1x1xf32>,
    } else {
    }
    return
  }
  func.func @transform_0(%arg0: i32) -> (i32, i32) {
    %c0_i32 = arith.constant 0 : i32
    %c0_i32_0 = arith.constant 0 : i32
    return %arg0, %c0_i32 : i32, i32
  }
  func.func @transform_1(%arg0: i32) -> (i32, i32) {
    %c0_i32 = arith.constant 0 : i32
    %c0_i32_0 = arith.constant 0 : i32
    return %arg0, %c0_i32 : i32, i32
  }
  func.func @transform_2(%arg0: i32) -> (i32, i32) {
    %c0_i32 = arith.constant 0 : i32
    %c0_i32_0 = arith.constant 0 : i32
    %c0_i32_1 = arith.constant 0 : i32
    return %c0_i32, %c0_i32_0 : i32, i32
  }
}

</mosaic_0001>

<bundles_post_ra>
// kernel: dice_bce_loss.1
= control target key start
LH: loop header
LB: loop body
LE: loop exit
PB: predicated region body
PF: predicated region fallthrough
CT: control target
= control target key end

     0   :  { %v292_v2 = vmov 0.0   ;;  %s386_s0 = inlined_call_operand.vmem [shape: f32[16,128], index: 0, kind: input, shape index: {}]   ;;  %s387_s1 = inlined_call_operand.vmem [shape: f32[16,128], index: 1, kind: input, shape index: {}]   ;;  %s388_s2 = inlined_call_operand.hbm [shape: f32[1,1], index: 2, kind: output, shape index: {}]  }
   0x1   :  { %v313_v0 = vld [vmem:[%s386_s0] sm:$0xff]  ;;  %v318_v1 = vld [vmem:[%s386_s0 + $0x8] sm:$0xff]  ;;  %16 = vst [vmem:[#allocation2] sm:$0x1] %v292_v2 }
   0x2   :  { %v24_v3 = vand.u32 2147483647, %v313_v0  ;;  %v25_v4 = vand.u32 2147483647, %v318_v1  ;;  %17 = vst [vmem:[#allocation3] sm:$0x1] %v292_v2 }
   0x3   :  { %18 = vst [vmem:[#allocation4] sm:$0x1] %v292_v2 }
   0x4   :  { %v26_v5 = vsub.f32 0.0, %v24_v3 }
   0x5   :  { %7 = vsyncpa [#allocation7], 0  ;;  %v27_v6 = vsub.f32 0.0, %v25_v4  ;;  %19 = vst [vmem:[#allocation5] sm:$0x1] %v292_v2  ;;  %v325_v9 = vld [vmem:[%s387_s1] sm:$0xff] }
   0x6   :  { %v28_v7 = vmul.f32 1.442695, %v26_v5  ;;  %v330_v10 = vld [vmem:[%s387_s1 + $0x8] sm:$0xff]  ;;  %v72_v24 = vmul.f32 %v325_v9, %v313_v0  ;;  %v70_v44 = vmax.f32 %v313_v0, 0.0  ;;  %v71_v45 = vmax.f32 %v318_v1, 0.0  ;;  %s294_s19 = smov [#allocation6]  }
   0x7   :  { %v30_v8 = vmul.f32 1.442695, %v27_v6  ;;  %v119_v11 = vadd.f32 %v330_v10, %v325_v9  ;;  %v73_v25 = vmul.f32 %v330_v10, %v318_v1  ;;  %vm64_vm9 = vcmp.ge.f32.partialorder %v313_v0, 0.0  ;;  %s228_s20 = sshll.u32 %s294_s19, 4  ;;  %s230_s23 = sshll.u32 %s388_s2, 4  ;;  %s229_s20 = int_to_ptr.vmem [resolvable:$true] %s228_s20  ;;  %s231_s23 = int_to_ptr.hbm [resolvable:$true] %s230_s23 }
   0x8   :  { %250 = vpow2.f32 %v28_v7  ;;  %v74_v53 = vsub.f32 %v70_v44, %v72_v24  ;;  %vm65_vm11 = vcmp.ge.f32.partialorder %v318_v1, 0.0  ;;  %vm142_vm12 = vcmask 1040384  }
   0x9   :  { %252 = vpow2.f32 %v30_v8  ;;  %v120_v12 = vrot.slane %v119_v11, 4  ;;  %v75_v54 = vsub.f32 %v71_v45, %v73_v25 }
   0xa   :  { %v118_v28 = vld [vmem:[#allocation4] sm:$0x1] }
   0xb   :  { %v121_v14 = vadd.f32 %v120_v12, %v119_v11 }
   0xd   :  { %v122_v18 = vrot.slane %v121_v14, 2 }
   0xe   :  { %v334_v13 = vpop.eup %250 }
   0xf   :  { %v336_v15 = vpop.eup %252  ;;  %v32_v16 = vadd.f32 1.0, %v334_v13  ;;  %v123_v19 = vadd.f32 %v122_v18, %v121_v14  ;;  %v79_v33 = vmul.f32 -0.5, %v334_v13  ;;  %v82_v50 = vand.u32 2147483647, %v334_v13 }
  0x10   :  { %v33_v17 = vadd.f32 1.0, %v336_v15  ;;  %v88_v34 = vmul.f32 -0.5, %v336_v15  ;;  %v91_v59 = vand.u32 2147483647, %v336_v15 }
  0x11   :  { %254 = vrcp.f32 %v32_v16  ;;  %v43_v20 = vand.u32 2147483647, %v32_v16  ;;  %v45_v21 = vand.u32 2147483648, %v32_v16  ;;  %v124_v23 = vrot.slane %v123_v19, 1 }
  0x12   :  { %256 = vrcp.f32 %v33_v17  ;;  %v60_v22 = vand.u32 2147483648, %v33_v17  ;;  %vm39_vm0 = vweird.f32 %v32_v16  ;;  %vm54_vm1 = vweird.f32 %v33_v17 }
  0x13   :  { %258 = vlog2.f32 %v32_v16  ;;  %v58_v27 = vand.u32 2147483647, %v33_v17  ;;  %v125_v29 = vadd.f32 %v124_v23, %v123_v19  ;;  %vm344_vm2 = vcmp.eq.f32.partialorder %v43_v20, 8.507059e+37 }
  0x14   :  { %260 = vlog2.f32 %v33_v17  ;;  %v46_v35 = vor.u32 1.1754944e-38, %v45_v21  ;;  %v61_v37 = vor.u32 1.1754944e-38, %v60_v22  ;;  %v80_v40 = vadd.f32 1.0, %v79_v33  ;;  %v108_v33 = vld [vmem:[#allocation3] sm:$0x1] }
  0x15   :  { %v126_v38 = vadd.f32 %v125_v29, %v118_v28  ;;  %v89_v41 = vadd.f32 1.0, %v88_v34  ;;  %vm83_vm7 = vcmp.lt.f32.partialorder %v82_v50, 0.0004427343  ;;  %vm59_vm8 = vcmp.eq.f32.partialorder %v58_v27, 8.507059e+37 }
  0x16   :  { %v81_v49 = vmul.f32 %v334_v13, %v80_v40  ;;  %vm92_vm10 = vcmp.lt.f32.partialorder %v91_v59, 0.0004427343 }
  0x17   :  { %v255_v26 = vpop.eup %254  ;;  %127 = vst [vmem:[#allocation4] sm:$0x1] %v126_v38  ;;  %v90_v58 = vmul.f32 %v336_v15, %v89_v41 }
  0x18   :  { %v257_v30 = vpop.eup %256  ;;  %v35_v31 = vmul.f32 %v255_v26, %v32_v16  ;;  %vm40_vm3 = vweird.f32 %v255_v26 }
  0x19   :  { %v50_v36 = vmul.f32 %v257_v30, %v33_v17  ;;  %v259_v42 = vpop.eup %258  ;;  %vm55_vm4 = vweird.f32 %v257_v30  ;;  %vm355_vm5 = vmor %vm39_vm0, %vm40_vm3 }
  0x1a   :  { %v36_v39 = vsub.f32 1.0, %v35_v31  ;;  %v261_v46 = vpop.eup %260  ;;  %v78_v48 = vmul.f32 0.6931472, %v259_v42  ;;  %vm361_vm6 = vmor %vm54_vm1, %vm55_vm4 }
  0x1b   :  { %v51_v43 = vsub.f32 1.0, %v50_v36  ;;  %v87_v55 = vmul.f32 0.6931472, %v261_v46  ;;  %v98_v36 = vld [vmem:[#allocation2] sm:$0x1] }
  0x1c   :  { %v37_v47 = vmul.f32 %v255_v26, %v36_v39  ;;  %v84_v61 = vsel %vm83_vm7, %v81_v49, %v78_v48 }
  0x1d   :  { %v52_v52 = vmul.f32 %v257_v30, %v51_v43  ;;  %v94_v63 = vadd.f32 %v84_v61, %v74_v53  ;;  %v93_v4 = vsel %vm92_vm10, %v90_v58, %v87_v55 }
  0x1e   :  { %v38_v56 = vadd.f32 %v255_v26, %v37_v47  ;;  %v166_v7 = vld [vmem:[#allocation4] sm:$0x1]  ;;  %v95_v8 = vadd.f32 %v93_v4, %v75_v54 }
  0x1f   :  { %v53_v60 = vadd.f32 %v257_v30, %v52_v52  ;;  %v167_v0 = vsel %vm142_vm12, %v166_v7, 0.0 }
  0x20   :  { %v42_v62 = vsel %vm355_vm5, %v255_v26, %v38_v56  ;;  %168 = vadd.xlane.f32.xlu1 %v167_v0  ;;  %v129_v14 = vadd.f32 %v95_v8, %v94_v63 }
  0x21   :  { %v47_v2 = vsel %vm344_vm2, %v46_v35, %v42_v62  ;;  %v57_v3 = vsel %vm361_vm6, %v257_v30, %v53_v60  ;;  %v128_v30 = vld [vmem:[#allocation5] sm:$0x1]  ;;  %vm221_vm2 = vcmask 0  }
  0x22   :  { %v62_v5 = vsel %vm59_vm8, %v61_v37, %v57_v3  ;;  %v66_v6 = vmul.f32 %v334_v13, %v47_v2  ;;  %v130_v19 = vrot.slane %v129_v14, 4 }
  0x23   :  { %v67_v11 = vmul.f32 %v336_v15, %v62_v5 }
  0x24   :  { %v68_v12 = vsel %vm64_vm9, %v47_v2, %v66_v6  ;;  %v131_v13 = vadd.f32 %v130_v19, %v129_v14  ;;  %v293_v14 = vmov 2048.0  }
  0x25   :  { %v69_v16 = vsel %vm65_vm11, %v62_v5, %v67_v11  ;;  %v96_v17 = vmul.f32 %v68_v12, %v325_v9  ;;  %262 = vrcp.f32 %v293_v14 }
  0x26   :  { %v97_v18 = vmul.f32 %v69_v16, %v330_v10  ;;  %v109_v1 = vadd.f32 %v69_v16, %v68_v12  ;;  %v132_v24 = vrot.slane %v131_v13, 2 }
  0x28   :  { %v99_v20 = vadd.f32 %v97_v18, %v96_v17  ;;  %v110_v21 = vrot.slane %v109_v1, 4  ;;  %v133_v26 = vadd.f32 %v132_v24, %v131_v13 }
  0x2a   :  { %v100_v22 = vrot.slane %v99_v20, 4  ;;  %v111_v23 = vadd.f32 %v110_v21, %v109_v1  ;;  %v134_v29 = vrot.slane %v133_v26, 1 }
  0x2b   :  { %v263_v17 = vpop.eup %262 }
  0x2c   :  { %v101_v25 = vadd.f32 %v100_v22, %v99_v20  ;;  %v112_v15 = vrot.slane %v111_v23, 2  ;;  %v135_v9 = vadd.f32 %v134_v29, %v133_v26  ;;  %v211_v20 = vmul.f32 2048.0, %v263_v17 }
  0x2d   :  { %vm215_vm13 = vweird.f32 %v263_v17 }
  0x2e   :  { %v102_v27 = vrot.slane %v101_v25, 2  ;;  %v113_v28 = vadd.f32 %v112_v15, %v111_v23  ;;  %v136_v35 = vadd.f32 %v135_v9, %v128_v30  ;;  %v212_v21 = vsub.f32 1.0, %v211_v20 }
  0x30   :  { %v103_v31 = vadd.f32 %v102_v27, %v101_v25  ;;  %v114_v32 = vrot.slane %v113_v28, 1  ;;  %137 = vst [vmem:[#allocation5] sm:$0x1] %v136_v35  ;;  %v213_v22 = vmul.f32 %v263_v17, %v212_v21 }
  0x32   :  { %v104_v10 = vrot.slane %v103_v31, 1  ;;  %v115_v34 = vadd.f32 %v114_v32, %v113_v28  ;;  %v214_v26 = vadd.f32 %v263_v17, %v213_v22 }
  0x34   :  { %v105_v37 = vadd.f32 %v104_v10, %v103_v31  ;;  %v116_v38 = vadd.f32 %v115_v34, %v108_v33  ;;  %v216_v9 = vsel %vm215_vm13, %v263_v17, %v214_v26 }
  0x36   :  { %v106_v39 = vadd.f32 %v105_v37, %v98_v36  ;;  %117 = vst [vmem:[#allocation3] sm:$0x1] %v116_v38 }
  0x37   :  { %v178_v40 = vld [vmem:[#allocation5] sm:$0x1] }
  0x38   :  { %107 = vst [vmem:[#allocation2] sm:$0x1] %v106_v39  ;;  %v179_v41 = vsel %vm142_vm12, %v178_v40, 0.0 }
  0x39   :  { %180 = vadd.xlane.f32.xlu1 %v179_v41 }
  0x3d   :  { %v154_v44 = vld [vmem:[#allocation3] sm:$0x1] }
  0x3e   :  { %v155_v45 = vsel %vm142_vm12, %v154_v44, 0.0 }
  0x3f   :  { %v141_v42 = vld [vmem:[#allocation2] sm:$0x1] }
  0x40   :  { %v143_v43 = vsel %vm142_vm12, %v141_v42, 0.0 }
  0x41   :  { %144 = vadd.xlane.f32.xlu0 %v143_v43 }
  0x49   :  { %156 = vadd.xlane.f32.xlu0 %v155_v45 }
  0x93   :  { %v169_v46 = vpop.xlane.xlu1 %168 }
  0x94   :  { %v170_v50 = vrot.slane %v169_v46, 4 }
  0x96   :  { %v171_v54 = vadd.f32 %v170_v50, %v169_v46 }
  0x98   :  { %v172_v58 = vrot.slane %v171_v54, 2 }
  0x9a   :  { %v173_v3 = vadd.f32 %v172_v58, %v171_v54 }
  0x9c   :  { %v174_v7 = vrot.slane %v173_v3, 1 }
  0x9e   :  { %v175_v12 = vadd.f32 %v174_v7, %v173_v3 }
  0xac   :  { %v181_v47 = vpop.xlane.xlu1 %180 }
  0xad   :  { %v182_v48 = vrot.slane %v181_v47, 4 }
  0xaf   :  { %v183_v53 = vadd.f32 %v182_v48, %v181_v47 }
  0xb1   :  { %v184_v57 = vrot.slane %v183_v53, 2 }
  0xb3   :  { %v185_v2 = vadd.f32 %v184_v57, %v183_v53 }
  0xb4   :  { %v145_v49 = vpop.xlane.xlu0 %144 }
  0xb5   :  { %v146_v51 = vrot.slane %v145_v49, 4  ;;  %v186_v6 = vrot.slane %v185_v2, 1 }
  0xb7   :  { %v147_v52 = vadd.f32 %v146_v51, %v145_v49  ;;  %v187_v0 = vadd.f32 %v186_v6, %v185_v2 }
  0xb9   :  { %v148_v55 = vrot.slane %v147_v52, 2 }
  0xbb   :  { %v149_v56 = vadd.f32 %v148_v55, %v147_v52 }
  0xbc   :  { %v157_v59 = vpop.xlane.xlu0 %156 }
  0xbd   :  { %v158_v60 = vrot.slane %v157_v59, 4  ;;  %v150_v61 = vrot.slane %v149_v56, 1 }
  0xbf   :  { %v159_v62 = vadd.f32 %v158_v60, %v157_v59  ;;  %v151_v63 = vadd.f32 %v150_v61, %v149_v56 }
  0xc1   :  { %v160_v4 = vrot.slane %v159_v62, 2  ;;  %239 = vpush %v151_v63 }
  0xc3   :  { %v161_v5 = vadd.f32 %v160_v4, %v159_v62 }
  0xc5   :  { %v162_v8 = vrot.slane %v161_v5, 1 }
  0xc7   :  { %v163_v11 = vadd.f32 %v162_v8, %v161_v5 }
  0xc9   :  { %241 = vpush %v163_v11 }
  0xca   :  { %243 = vpush %v175_v12 }
  0xcb   :  { %245 = vpush %v187_v0 }
  0xf2   :  { %s240_s1 = spop %239 }
  0xf3   :  { %v153_v24 = vstv %s240_s1 }
  0xf4   :  { %v190_v27 = vmul.f32 2.0, %v153_v24 }
  0xf6   :  { %v191_v33 = vadd.f32 1e-06, %v190_v27 }
  0xfa   :  { %s242_s16 = spop %241 }
  0xfb   :  { %v165_v16 = vstv %s242_s16  ;;  %s244_s17 = spop %243 }
  0xfc   :  { %v177_v18 = vstv %s244_s17  ;;  %s246_s18 = spop %245 }
  0xfd   :  { %v192_v1 = vadd.f32 %v177_v18, %v165_v16  ;;  %v189_v31 = vstv %s246_s18 }
  0xfe   :  { %v217_v36 = vmul.f32 %v216_v9, %v189_v31 }
  0xff   :  { %v193_v19 = vadd.f32 1e-06, %v192_v1 }
 0x100   :  { %v219_v39 = vmul.f32 0.5, %v217_v36 }
 0x101   :  { %264 = vrcp.f32 %v193_v19  ;;  %v205_v15 = vand.u32 2147483648, %v193_v19  ;;  %v203_v29 = vand.u32 2147483647, %v193_v19  ;;  %vm199_vm15 = vweird.f32 %v193_v19 }
 0x103   :  { %v206_v32 = vor.u32 1.1754944e-38, %v205_v15  ;;  %vm204_vm1 = vcmp.eq.f32.partialorder %v203_v29, 8.507059e+37 }
 0x107   :  { %v265_v13 = vpop.eup %264 }
 0x108   :  { %v195_v23 = vmul.f32 %v265_v13, %v193_v19  ;;  %vm200_vm14 = vweird.f32 %v265_v13 }
 0x109   :  { %vm201_vm0 = vmor %vm199_vm15, %vm200_vm14 }
 0x10a   :  { %v196_v25 = vsub.f32 1.0, %v195_v23 }
 0x10c   :  { %v197_v28 = vmul.f32 %v265_v13, %v196_v25 }
 0x10e   :  { %v198_v30 = vadd.f32 %v265_v13, %v197_v28 }
 0x110   :  { %v202_v10 = vsel %vm201_vm0, %v265_v13, %v198_v30 }
 0x111   :  { %v207_v34 = vsel %vm204_vm1, %v206_v32, %v202_v10 }
 0x112   :  { %v208_v35 = vmul.f32 %v207_v34, %v191_v33 }
 0x114   :  { %v209_v37 = vsub.f32 1.0, %v208_v35 }
 0x116   :  { %v218_v38 = vmul.f32 0.5, %v209_v37 }
 0x118   :  { %v220_v40 = vadd.f32 %v219_v39, %v218_v38 }
 0x11a   :  { %222 = vst.msk [vmem:[#allocation6] sm:$0x1] %vm221_vm2, %v220_v40 }
 0x11b   :  { %233 = dma.vmem_to_hbm [thread:$0]  %s229_s20, 16, %s231_s23, [#allocation7]  }
 0x11c   :  { %290 = dma.done.wait [#allocation7], 16  }
 0x11d   :  { %291 = vsyncadd [#allocation7], 4294967280 }
 0x11e   :  { %238 = vsyncpa [#allocation7], 1 }

</bundles_post_ra>
